<compile_context>
chip_gen: v6e
topology: v6e:2x2x1
jax: 0.10.0
libtpu: 0.0.40
codegen_flags: <defaults>
</compile_context>

<pallas_src>
import jax
import jax.numpy as jnp
from jax.experimental import pallas as pl
from jax.experimental.pallas import tpu as pltpu

LANE = 128  # lane width used to pad the output dimension for a dense store


def _qnet_kernel(x_ref, p1_ref, p2_ref, out_ref):
    # x_ref:   (B, In)
    # p1_ref:  (In+1, H)     rows 0..In-1 = W1.T, row In = b1
    # p2_ref:  (H+1, Opad)   rows 0..H-1  = W2.T (zero-padded to Opad lanes), row H = b2
    # out_ref: (B, Opad)     lane-dense padded output; cols >= output_size are 0
    in_size = x_ref.shape[1]
    hidden = p2_ref.shape[0] - 1

    x = x_ref[...]
    p1 = p1_ref[...]
    p2 = p2_ref[...]

    w1 = p1[:in_size, :]   # (In, H)   -- static value slices, no transpose needed
    b1 = p1[in_size:, :]   # (1, H)
    w2 = p2[:hidden, :]    # (H, Opad)
    b2 = p2[hidden:, :]    # (1, Opad)

    # linear1 + ReLU (f32 MXU accumulation, f32 epilogue)
    h = jnp.maximum(jnp.dot(x, w1, preferred_element_type=jnp.float32) + b1, 0.0)
    # linear2 -> lane-dense (B, Opad) result, single unmasked store
    out = jnp.dot(h, w2, preferred_element_type=jnp.float32) + b2
    out_ref[...] = out.astype(out_ref.dtype)


def pack_params(w1, b1, w2, b2, out_pad=LANE):
    """One-time repack of PyTorch-layout params into two kernel slabs.

    Do this once at model-load time, NOT per forward call:
      p1 = [W1.T ; b1]                       shape (In+1, H)
      p2 = [W2.T ; b2] zero-padded to 128    shape (H+1, out_pad)
    """
    hidden, _ = w1.shape
    out_size = w2.shape[0]
    p1 = jnp.concatenate([w1.T, b1[None, :]], axis=0)                       # (In+1, H)
    w2t = jnp.zeros((hidden, out_pad), w2.dtype).at[:, :out_size].set(w2.T)  # (H, out_pad)
    b2p = jnp.zeros((1, out_pad), b2.dtype).at[0, :out_size].set(b2)         # (1, out_pad)
    p2 = jnp.concatenate([w2t, b2p], axis=0)                                 # (H+1, out_pad)
    return p1, p2


def linear_qnet_forward(x, p1, p2, out_size):
    """Two-layer MLP fully inside one grid-free Pallas kernel.

    All operands fit trivially in VMEM, so no grid and no BlockSpec tiling:
    whole arrays are placed in VMEM (3 input DMAs, 1 output DMA).
    """
    batch = x.shape[0]
    out_pad = p2.shape[1]
    out_padded = pl.pallas_call(
        _qnet_kernel,
        out_shape=jax.ShapeDtypeStruct((batch, out_pad), x.dtype),
        in_specs=[
            pl.BlockSpec(memory_space=pltpu.MemorySpace.VMEM),  # x
            pl.BlockSpec(memory_space=pltpu.MemorySpace.VMEM),  # p1 = [W1.T ; b1]
            pl.BlockSpec(memory_space=pltpu.MemorySpace.VMEM),  # p2 = [W2.T ; b2] padded
        ],
        out_specs=pl.BlockSpec(memory_space=pltpu.MemorySpace.VMEM),
    )(x, p1, p2)
    # Strip the lane padding back to the real number of actions.
    return out_padded[:, :out_size]


def init_params(key, input_size, hidden_size, output_size, dtype=jnp.float32):
    """Deterministic init mimicking nn.Linear default (uniform +/- 1/sqrt(fan_in))."""
    k1, k2, k3, k4 = jax.random.split(key, 4)
    bound1 = 1.0 / jnp.sqrt(input_size)
    bound2 = 1.0 / jnp.sqrt(hidden_size)
    w1 = jax.random.uniform(k1, (hidden_size, input_size), dtype, -bound1, bound1)
    b1 = jax.random.uniform(k2, (hidden_size,), dtype, -bound1, bound1)
    w2 = jax.random.uniform(k3, (output_size, hidden_size), dtype, -bound2, bound2)
    b2 = jax.random.uniform(k4, (output_size,), dtype, -bound2, bound2)
    return w1, b1, w2, b2


if __name__ == "__main__":
    # Shapes consistent with the module: batch=8, input=11 (snake state),
    # hidden=32, output=3 (actions).
    batch, input_size, hidden_size, output_size = 8, 11, 32, 3

    key = jax.random.PRNGKey(0)
    kx, kp = jax.random.split(key)
    x = jax.random.normal(kx, (batch, input_size), dtype=jnp.float32)
    w1, b1, w2, b2 = init_params(kp, input_size, hidden_size, output_size)

    # One-time parameter repack (transpose + bias fold + output-lane padding).
    p1, p2 = pack_params(w1, b1, w2, b2)

    out = linear_qnet_forward(x, p1, p2, output_size)
    out = jax.block_until_ready(out)

    # Pure-JAX reference check (PyTorch forward semantics).
    ref = jnp.maximum(x @ w1.T + b1, 0.0) @ w2.T + b2
    assert out.shape == (batch, output_size)
    assert jnp.allclose(out, ref, atol=1e-5, rtol=1e-5), "mismatch vs reference"

    print("KERNEL_OK")
</pallas_src>

<mosaic_0001>
module attributes {stable_mosaic.version = 11 : i64} {
  func.func @_qnet_kernel(%arg0: memref<8x11xf32, #tpu.memory_space<vmem>>, %arg1: memref<12x32xf32, #tpu.memory_space<vmem>>, %arg2: memref<33x128xf32, #tpu.memory_space<vmem>>, %arg3: memref<8x128xf32, #tpu.memory_space<vmem>>) attributes {dimension_semantics = [], scalar_prefetch = 0 : i64, scratch_operands = 0 : i64, tpu.core_type = #tpu.core_type<tc>} {
    %c0 = arith.constant 0 : index
    %c0_0 = arith.constant 0 : index
    %0 = vector.load %arg0[%c0, %c0_0] : memref<8x11xf32, #tpu.memory_space<vmem>>, vector<8x11xf32>
    %c0_1 = arith.constant 0 : index
    %c0_2 = arith.constant 0 : index
    %1 = vector.load %arg1[%c0_1, %c0_2] : memref<12x32xf32, #tpu.memory_space<vmem>>, vector<12x32xf32>
    %c0_3 = arith.constant 0 : index
    %c0_4 = arith.constant 0 : index
    %2 = vector.load %arg2[%c0_3, %c0_4] : memref<33x128xf32, #tpu.memory_space<vmem>>, vector<33x128xf32>
    %3 = vector.extract_strided_slice %1 {offsets = [0, 0], sizes = [11, 32], strides = [1, 1]} : vector<12x32xf32> to vector<11x32xf32>
    %4 = vector.extract_strided_slice %1 {offsets = [11, 0], sizes = [1, 32], strides = [1, 1]} : vector<12x32xf32> to vector<1x32xf32>
    %5 = vector.extract_strided_slice %2 {offsets = [0, 0], sizes = [32, 128], strides = [1, 1]} : vector<33x128xf32> to vector<32x128xf32>
    %6 = vector.extract_strided_slice %2 {offsets = [32, 0], sizes = [1, 128], strides = [1, 1]} : vector<33x128xf32> to vector<1x128xf32>
    %cst = arith.constant dense<0.000000e+00> : vector<8x32xf32>
    %7 = tpu.matmul %0, %3, %cst {dimension_numbers = #tpu.dot_dimension_numbers<[1], [0], [0], [1], [0, 0, 1, 1], [], []>} : vector<8x11xf32>, vector<11x32xf32>, vector<8x32xf32> -> vector<8x32xf32>
    %8 = vector.broadcast %4 : vector<1x32xf32> to vector<8x32xf32>
    %9 = arith.addf %7, %8 : vector<8x32xf32>
    %cst_5 = arith.constant 0.000000e+00 : f32
    %10 = vector.broadcast %cst_5 : f32 to vector<8x32xf32>
    %11 = arith.maximumf %9, %10 : vector<8x32xf32>
    %cst_6 = arith.constant dense<0.000000e+00> : vector<8x128xf32>
    %12 = tpu.matmul %11, %5, %cst_6 {dimension_numbers = #tpu.dot_dimension_numbers<[1], [0], [0], [1], [0, 0, 1, 1], [], []>} : vector<8x32xf32>, vector<32x128xf32>, vector<8x128xf32> -> vector<8x128xf32>
    %13 = vector.broadcast %6 : vector<1x128xf32> to vector<8x128xf32>
    %14 = arith.addf %12, %13 : vector<8x128xf32>
    %c0_7 = arith.constant 0 : index
    %c0_8 = arith.constant 0 : index
    %15 = vector.load %arg3[%c0_7, %c0_8] : memref<8x128xf32, #tpu.memory_space<vmem>>, vector<8x128xf32>
    tpu.vector_store %arg3[%c0_7, %c0_8], %14 {strides = array<i32>} : memref<8x128xf32, #tpu.memory_space<vmem>>, vector<8x128xf32>,
    return
  }
}

</mosaic_0001>

<bundles_post_ra>
// kernel: tpu_custom_call.1
= control target key start
LH: loop header
LB: loop body
LE: loop exit
PB: predicated region body
PF: predicated region fallthrough
CT: control target
= control target key end

     0   :  { %8 = vsyncpa [#allocation3], 0  ;;  %s404_s0 = inlined_call_operand.hbm [shape: f32[8,11], index: 0, kind: input, shape index: {}]   ;;  %s405_s1 = inlined_call_operand.hbm [shape: f32[12,32], index: 1, kind: input, shape index: {}]   ;;  %s406_s2 = inlined_call_operand.hbm [shape: f32[33,128], index: 2, kind: input, shape index: {}]   ;;  %s407_s3 = inlined_call_operand.hbm [shape: f32[8,128], index: 3, kind: output, shape index: {}]  }
   0x1   :  { %9 = vsyncpa [#allocation6], 0 }
   0x2   :  { %10 = vsyncpa [#allocation4], 0  ;;  %s364_s12 = smov [#allocation5]  }
   0x3   :  { %s26_s13 = sshll.u32 %s364_s12, 4  ;;  %s27_s13 = int_to_ptr.vmem [resolvable:$true] %s26_s13 }
   0x4   :  { %s286_s14 = scalar_lea.vmem %s27_s13, 256  ;;  %p291_p1 = scmp.lt.s32.totalorder %s27_s13, %s27_s13 }
   0x5   :  { %p287_p0 = scmp.ne.s32.totalorder %s27_s13, %s286_s14  ;;  %p292_p2 = scmp.lt.s32.totalorder %s286_s14, %s286_s14 }
   0x7   :  { %p293_p3 = por %p292_p2, %p291_p1 }
   0x9   :  { %p294_p4 = pnand %p293_p3, %p287_p0 }
   0xb   :  { %297 = shalt.err (!%p294_p4)
}
   0xc   :  { %s365_s15 = smov 128   ;;  %s366_s16 = smov 8  }
   0xd   :  { %32 = dma.hbm_to_vmem [thread:$0]  %s405_s1, 256, %s27_s13, [#allocation6], %s365_s15, %s365_s15, %s366_s16  }
   0xe   :  { %s367_s19 = smov [#allocation2]   ;;  %s368_s21 = smov [#allocation7]  }
   0xf   :  { %s17_s20 = sshll.u32 %s367_s19, 4  ;;  %s38_s22 = sshll.u32 %s368_s21, 4  ;;  %s18_s20 = int_to_ptr.vmem [resolvable:$true] %s17_s20  ;;  %s39_s22 = int_to_ptr.vmem [resolvable:$true] %s38_s22 }
  0x10   :  { %s306_s23 = scalar_lea.vmem %s18_s20, 128  ;;  %p311_p6 = scmp.lt.s32.totalorder %s18_s20, %s18_s20 }
  0x11   :  { %p307_p5 = scmp.ne.s32.totalorder %s18_s20, %s306_s23  ;;  %p312_p7 = scmp.lt.s32.totalorder %s306_s23, %s306_s23 }
  0x13   :  { %p313_p8 = por %p312_p7, %p311_p6 }
  0x15   :  { %p314_p9 = pnand %p313_p8, %p307_p5 }
  0x17   :  { %317 = shalt.err (!%p314_p9)
}
  0x18   :  { %20 = dma.hbm_to_vmem [thread:$0]  %s404_s0, 128, %s18_s20, [#allocation3]  }
  0x19   :  { %s326_s26 = scalar_lea.vmem %s39_s22, 640  ;;  %p331_p11 = scmp.lt.s32.totalorder %s39_s22, %s39_s22 }
  0x1a   :  { %p327_p10 = scmp.ne.s32.totalorder %s39_s22, %s326_s26  ;;  %p332_p12 = scmp.lt.s32.totalorder %s326_s26, %s326_s26 }
  0x1c   :  { %p333_p13 = por %p332_p12, %p331_p11 }
  0x1e   :  { %p334_p0 = pnand %p333_p13, %p327_p10 }
  0x20   :  { %337 = shalt.err (!%p334_p0)
}
  0x21   :  { %44 = dma.hbm_to_vmem [thread:$0]  %s406_s2, 640, %s39_s22, [#allocation6], %s365_s15, %s365_s15, %s366_s16  }
  0x22   :  { %358 = dma.done.wait [#allocation3], 128  }
  0x23   :  { %359 = vsyncadd [#allocation3], 4294967168 }
  0x24   :  { %360 = dma.done.wait [#allocation6], 896  }
  0x25   :  { %361 = vsyncadd [#allocation6], 4294966400  ;;  %v369_v0 = vmov 0.0   ;;  %vm370_vm0 = vmmov 0   ;;  %vm70_vm1 = vcmask 1042432   ;;  %v55_v2 = vld [vmem:[#allocation5] sm:$0xff]  ;;  %v62_v8 = vlaneseq }
  0x26   :  { %252 = vmatprep.subr.mxu0 %v369_v0  ;;  %256 = vmatprep.mubr.msk.f32.mxu0 %vm370_vm0, %v369_v0  ;;  %v56_v1 = vld [vmem:[#allocation5 + $0x8] sm:$0xf]  ;;  %v54_v3 = vld [vmem:[#allocation2] sm:$0xff]  ;;  %vm66_vm2 = vcmask 89088   ;;  %v59_v5 = vld [vmem:[#allocation7 + $0x10] sm:$0xff]  ;;  %vm149_vm3 = vcmask 261120  }
  0x27   :  { %259 = vmatprep.subr.mxu1 %v369_v0  ;;  %267 = vmatprep.mubr.msk.f32.mxu1 %vm370_vm0, %v369_v0  ;;  %v60_v4 = vld [vmem:[#allocation7 + $0x18] sm:$0xff]  ;;  %v58_v6 = vld [vmem:[#allocation7 + $0x8] sm:$0xff]  ;;  %v57_v7 = vld [vmem:[#allocation7] sm:$0xff]  ;;  %v63_v9 = vshrl.u32 %v62_v8, 7  ;;  %s371_s0 = smov [#allocation8]  }
  0x28   :  { %253 = vmatpush3.msk.msra.mxu0 %vm70_vm1, %v56_v1  ;;  %260 = vmatpush3.msra.mxu1 %v60_v4  ;;  %v242_v16 = vld [vmem:[#allocation7 + $0x20] ss:$0 sm:$0xff]  ;;  %s230_s2 = sshll.u32 %s371_s0, 4  ;;  %s231_s2 = int_to_ptr.vmem [resolvable:$true] %s230_s2 }
  0x29   :  { %254 = vmatprep.subr.mxu0 %v369_v0  ;;  %261 = vmatprep.subr.mxu1 %v369_v0  ;;  %v64_v10 = vsub.s32 3, %v63_v9  ;;  %s338_s28 = scalar_lea.vmem %s231_s2, 128  ;;  %p343_p2 = scmp.lt.s32.totalorder %s231_s2, %s231_s2 }
  0x2a   :  { %255 = vmatpush3.msra.mxu0 %v55_v2  ;;  %262 = vmatpush3.msra.mxu1 %v59_v5  ;;  %p339_p1 = scmp.ne.s32.totalorder %s231_s2, %s338_s28  ;;  %p344_p3 = scmp.lt.s32.totalorder %s338_s28, %s338_s28 }
  0x2b   :  { %257 = vmatmul.mubr.msk.f32.vlgmr.msra.gmra.mxu0 %vm66_vm2, %v54_v3  ;;  %263 = vmatprep.subr.mxu1 %v369_v0  ;;  %v65_v11 = vrot.slane %v56_v1, %v64_v10 }
  0x2c   :  { %264 = vmatpush3.msra.mxu1 %v58_v6  ;;  %p345_p4 = por %p344_p3, %p343_p2 }
  0x2d   :  { %265 = vmatprep.subr.mxu1 %v369_v0 }
  0x2e   :  { %266 = vmatpush3.msra.mxu1 %v57_v7  ;;  %p346_p5 = pnand %p345_p4, %p339_p1 }
  0xeb   :  { %v140_v12 = vpop.f32.mrf.mxu0 }
  0xec   :  { %v141_v13 = vadd.f32 %v140_v12, %v65_v11 }
  0xed   :  { %v258_v14 = vpop.f32.mrf.mxu0 }
  0xee   :  { %v144_v15 = vmax.f32 %v141_v13, 0.0 }
  0xf0   :  { %268 = vmatmul.mubr.msk.f32.vlgmr.msra.gmra.mxu1 %vm149_vm3, %v144_v15 }
 0x1b0   :  { %v219_v17 = vpop.f32.mrf.mxu1 }
 0x1b1   :  { %v220_v18 = vadd.f32 %v242_v16, %v219_v17 }
 0x1b2   :  { %v269_v19 = vpop.f32.mrf.mxu1 }
 0x1b3   :  { %223 = vst [vmem:[#allocation8] sm:$0xff] %v220_v18 }
 0x1b4   :  { %349 = shalt.err (!%p346_p5)
}
 0x1b5   :  { %233 = dma.vmem_to_hbm [thread:$0]  %s231_s2, 128, %s407_s3, [#allocation4]  }
 0x1b6   :  { %362 = dma.done.wait [#allocation4], 128  }
 0x1b7   :  { %363 = vsyncadd [#allocation4], 4294967168 }
 0x1b8   :  { %237 = vsyncpa [#allocation3], 1 }
 0x1b9   :  { %238 = vsyncpa [#allocation6], 1 }
 0x1ba   :  { %239 = vsyncpa [#allocation4], 1 }

</bundles_post_ra>
